<compile_context>
chip_gen: v7x
topology: tpu7x:2x2x1
jax: 0.10.0
libtpu: 0.0.40
codegen_flags: <defaults>
</compile_context>

<pallas_src>
import math

import jax
import jax.numpy as jnp
from jax.experimental import pallas as pl
from jax.experimental.pallas import tpu as pltpu


def _sin_pos_emb_kernel(x_ref, freqs_ref, out_ref):
    # x_ref:     (TB, 1)        f32  positions column for this tile
    # freqs_ref: (1, half_dim)  f32  constant frequency table (same block every step)
    # out_ref:   (TB, dim)      f32
    half_dim = freqs_ref.shape[1]
    emb = x_ref[...] * freqs_ref[...]            # (TB, half_dim) broadcast outer product
    # Two direct half-stores instead of a concatenate temporary.
    out_ref[:, :half_dim] = jnp.sin(emb)
    out_ref[:, half_dim:] = jnp.cos(emb)


def sinusoidal_pos_emb(x, dim, tb=512):
    """x: (B,) array of positions/timesteps. Returns (B, dim) float32 embedding."""
    assert dim % 2 == 0, f"dim must be even, got {dim}"
    assert dim >= 4, f"dim must be >= 4 (dim==2 divides by zero in the freq table), got {dim}"

    B = x.shape[0]
    half_dim = dim // 2

    # Constant frequency table, computed once in the wrapper (hoisted out of the kernel).
    scale = math.log(10000.0) / (half_dim - 1)
    freqs = jnp.exp(
        jnp.arange(half_dim, dtype=jnp.float32) * (-scale)
    ).reshape(1, half_dim)

    # Tile the batch axis: TB rows per grid step, multiple of 8 (sublane), capped at B.
    b_rounded = pl.cdiv(B, 8) * 8
    tb = max(8, min((int(tb) // 8) * 8, b_rounded))
    padded_B = pl.cdiv(B, tb) * tb
    num_blocks = padded_B // tb

    x2 = x.reshape(B, 1).astype(jnp.float32)
    if padded_B != B:
        x2 = jnp.pad(x2, ((0, padded_B - B), (0, 0)))

    out = pl.pallas_call(
        _sin_pos_emb_kernel,
        out_shape=jax.ShapeDtypeStruct((padded_B, dim), jnp.float32),
        grid=(num_blocks,),
        in_specs=[
            pl.BlockSpec((tb, 1), lambda i: (i, 0)),          # positions tile
            pl.BlockSpec((1, half_dim), lambda i: (0, 0)),    # constant freq table
        ],
        out_specs=pl.BlockSpec((tb, dim), lambda i: (i, 0)),
        compiler_params=pltpu.CompilerParams(
            dimension_semantics=("parallel",),                # megacore sharding on v7x
        ),
        cost_estimate=pl.CostEstimate(
            flops=B * dim,
            transcendentals=B * dim,
            bytes_accessed=4 * (B + half_dim + B * dim),
        ),
    )(x2, freqs)

    return out[:B] if padded_B != B else out


def _reference(x, dim):
    half_dim = dim // 2
    emb = math.log(10000.0) / (half_dim - 1)
    emb = jnp.exp(jnp.arange(half_dim, dtype=jnp.float32) * -emb)
    emb = x.astype(jnp.float32)[:, None] * emb[None, :]
    return jnp.concatenate([jnp.sin(emb), jnp.cos(emb)], axis=-1)


if __name__ == "__main__":
    key = jax.random.PRNGKey(0)

    # Config 1: small demo shape, multi-step grid (B=24, TB=8 -> 3 grid steps).
    B1, DIM1 = 24, 32
    k1, k2 = jax.random.split(key)
    x1 = jax.random.uniform(k1, (B1,), dtype=jnp.float32, minval=0.0, maxval=100.0)
    out1 = jax.block_until_ready(sinusoidal_pos_emb(x1, DIM1, tb=8))
    ref1 = _reference(x1, DIM1)
    assert out1.shape == (B1, DIM1) and out1.dtype == jnp.float32
    assert jnp.allclose(out1, ref1, atol=1e-5, rtol=1e-5), "mismatch vs reference (config 1)"

    # Config 2: lane-aligned halves (half_dim=128) + ragged batch (padding path).
    B2, DIM2 = 40, 256
    x2 = jax.random.uniform(k2, (B2,), dtype=jnp.float32, minval=0.0, maxval=100.0)
    out2 = jax.block_until_ready(sinusoidal_pos_emb(x2, DIM2, tb=16))
    ref2 = _reference(x2, DIM2)
    assert out2.shape == (B2, DIM2) and out2.dtype == jnp.float32
    assert jnp.allclose(out2, ref2, atol=1e-5, rtol=1e-5), "mismatch vs reference (config 2)"

    print("KERNEL_OK")
</pallas_src>

<mosaic_0001>
module attributes {stable_mosaic.version = 11 : i64} {
  func.func @_sin_pos_emb_kernel(%arg0: i32, %arg1: memref<8x1xf32, #tpu.memory_space<vmem>>, %arg2: memref<1x16xf32, #tpu.memory_space<vmem>>, %arg3: memref<8x32xf32, #tpu.memory_space<vmem>>) attributes {dimension_semantics = [#tpu.dimension_semantics<parallel>], iteration_bounds = array<i64: 3>, scalar_prefetch = 0 : i64, scratch_operands = 0 : i64, tpu.core_type = #tpu.core_type<tc>, window_params = [{transform_indices = @transform_0, window_bounds = array<i64: 8, 1>}, {pipeline_mode = #tpu.pipeline_mode<synchronous>, transform_indices = @transform_1, window_bounds = array<i64: 1, 16>}, {transform_indices = @transform_2, window_bounds = array<i64: 8, 32>}]} {
    %c0 = arith.constant 0 : index
    %c0_0 = arith.constant 0 : index
    %0 = vector.load %arg1[%c0, %c0_0] : memref<8x1xf32, #tpu.memory_space<vmem>>, vector<8x1xf32>
    %c0_1 = arith.constant 0 : index
    %c0_2 = arith.constant 0 : index
    %1 = vector.load %arg2[%c0_1, %c0_2] : memref<1x16xf32, #tpu.memory_space<vmem>>, vector<1x16xf32>
    %2 = vector.broadcast %0 : vector<8x1xf32> to vector<8x16xf32>
    %3 = vector.broadcast %1 : vector<1x16xf32> to vector<8x16xf32>
    %4 = arith.mulf %2, %3 : vector<8x16xf32>
    %5 = math.sin %4 : vector<8x16xf32>
    %c0_3 = arith.constant 0 : index
    %c0_4 = arith.constant 0 : index
    %6 = vector.load %arg3[%c0_3, %c0_4] : memref<8x32xf32, #tpu.memory_space<vmem>>, vector<8x16xf32>
    tpu.vector_store %arg3[%c0_3, %c0_4], %5 {strides = array<i32>} : memref<8x32xf32, #tpu.memory_space<vmem>>, vector<8x16xf32>,
    %7 = math.cos %4 : vector<8x16xf32>
    %c0_5 = arith.constant 0 : index
    %c16 = arith.constant 16 : index
    %8 = vector.load %arg3[%c0_5, %c16] : memref<8x32xf32, #tpu.memory_space<vmem>>, vector<8x16xf32>
    tpu.vector_store %arg3[%c0_5, %c16], %7 {strides = array<i32>} : memref<8x32xf32, #tpu.memory_space<vmem>>, vector<8x16xf32>,
    return
  }
  func.func @transform_0(%arg0: i32) -> (i32, i32) {
    %c0_i32 = arith.constant 0 : i32
    %c0_i32_0 = arith.constant 0 : i32
    return %arg0, %c0_i32 : i32, i32
  }
  func.func @transform_1(%arg0: i32) -> (i32, i32) {
    %c0_i32 = arith.constant 0 : i32
    %c0_i32_0 = arith.constant 0 : i32
    %c0_i32_1 = arith.constant 0 : i32
    return %c0_i32, %c0_i32_0 : i32, i32
  }
  func.func @transform_2(%arg0: i32) -> (i32, i32) {
    %c0_i32 = arith.constant 0 : i32
    %c0_i32_0 = arith.constant 0 : i32
    return %arg0, %c0_i32 : i32, i32
  }
}

</mosaic_0001>

<bundles_post_ra>
// kernel: tpu_custom_call.1
= control target key start
LH: loop header
LB: loop body
LE: loop exit
PB: predicated region body
PF: predicated region fallthrough
CT: control target
= control target key end

     0   :  { %7 = vsyncpa [#allocation3], 0  ;;  %s733_s0 = inlined_call_operand.vmem [shape: f32[24,1], index: 0, kind: input, shape index: {}]   ;;  %s734_s1 = inlined_call_operand.vmem [shape: f32[1,16], index: 1, kind: input, shape index: {}]   ;;  %s735_s2 = inlined_call_operand.hbm [shape: f32[24,32], index: 2, kind: output, shape index: {}]  }
   0x1   :  { %9 = vsyncpa [#allocation3 + $0x1], 0  ;;  %s604_s9 = smov 0   ;;  %s606_s10 = smov 0  }
   0x2   :  { %s608_s11 = smov 0   ;;  %s610_s12 = smov 0  }
   0x3 LB: > { %s625_s13 = sadd.s32 4294967295, %s578_s12   ;;  %s441_s14 = sadd.s32 4294967294, %s578_s12   ;;  %s578_s12 = sphi %s610_s12, %s741_s12   ;;  %s574_s11 = sphi %s608_s11, %s740_s11   ;;  %s570_s10 = sphi %s606_s10, %s739_s10   ;;  %s566_s9 = sphi %s604_s9, %s738_s9  }
   0x4   : > { %s629_s15 = sadd.s32 1, %s578_s12   ;;  %s69_s16 = sadd.s32 1, %s574_s11 }
   0x5   : > { %s66_s17 = ssub.s32 %s578_s12, %s629_s15  ;;  %p79_p0 = scmp.ne.s32.totalorder %s574_s11, %s570_s10 }
   0x6   : > { %p67_p1 = scmp.eq.s32.totalorder %s66_s17, 0  ;;  %p80_p2 = scmp.eq.s32.totalorder %s625_s13, 2 }
   0x7   : > { %p85_p3 = scmp.ne.s32.totalorder %s570_s10, %s566_s9  ;;  %p86_p4 = scmp.eq.s32.totalorder %s441_s14, 2 }
   0x8   : > { %s640_s18 = scalar_select %p67_p1, %s574_s11, %s69_s16  }
   0x9   : > { %p642_p5 = por %p80_p2, %p79_p0  ;;  %p646_p6 = por %p86_p4, %p85_p3 }
   0xa   : > { %p444_p7 = scmp.ge.s32.totalorder %s578_s12, 1  ;;  %p114_p8 = scmp.lt.s32.totalorder %s578_s12, 4 }
   0xc   : > { %p115_p9 = pnand %p444_p7, %p114_p8 }
   0xd   : > { %p135_p10 = scmp.lt.s32.totalorder (!%p115_p9), %s625_s13, 2  ;;  %v580_v0 = vmov (!%p115_p9), 0   ;;  %v447_v2 = vld [vmem:[%s734_s1] ss:$0 sm:$0xff] (!%p115_p9)  ;;  %v581_v15 = vmov (!%p115_p9), 683565275  }
   0xe   : > { %118 = sbr.rel (%p115_p9) target bundleno = 364 (0x16c), region = 28  ;;  %511 = vset.pattern.permute.xlu0 (!%p115_p9), %v580_v0  ;;  %v582_v17 = vmov (!%p115_p9), 2475754826   ;;  %v583_v20 = vmov (!%p115_p9), 2131351028   ;;  %s132_s28 = sand.u32 (!%p115_p9), 1, %s570_s10  }
   0xf   : > { %v584_v23 = vmov (!%p115_p9), 2102212464   ;;  %v585_v26 = vmov (!%p115_p9), 920167782   ;;  %v586_v29 = vmov (!%p115_p9), 1326507024  }
  0x10   : > { %s445_s29 = sshll.u32 (!%p115_p9), %s132_s28, 3  ;;  %vm257_vm11 = vcmask (!%p115_p9), 130048   ;;  %s587_s30 = smov (!%p115_p9), 16  }
  0x11   : > { %s134_s3 = scalar_lea.vmem (!%p115_p9), [#allocation2], %s445_s29  ;;  %s457_s4 = sshll.u32 (!%p115_p9), %s625_s13, 7 }
  0x12   : > { %s382_s5 = sshll.u32 (!%p115_p9), %s134_s3, 4  ;;  %s689_s8 = scalar_lea.hbm (!%p115_p9), %s735_s2, %s457_s4  ;;  %s691_s5 = int_to_ptr.vmem [resolvable:$true] %s382_s5 }
  0x13   : > { %s369_s14 = scalar_lea.sflag (!%p115_p9), [#allocation3], %s132_s28  ;;  %s516_s16 = scalar_lea.vmem (!%p115_p9), %s691_s5, 128 }
  0x14   : > { %p517_p11 = scmp.ne.s32.totalorder (!%p115_p9), %s691_s5, %s516_s16 }
  0x15   : > { %s136_s21 = scalar_select %p135_p10, %s625_s13, 2 }
  0x16   : > { %p518_p12 = pnand %p517_p11, %p642_p5  ;;  %s588_s13 = smov [#allocation2]  }
  0x17   : > { %s446_s22 = sshll.u32 %s136_s21, 3  ;;  %s520_s17 = sshll.u32 %s588_s13, 4  ;;  %s521_s17 = int_to_ptr.vmem [resolvable:$false] %s520_s17 }
  0x18   : > { %s138_s25 = scalar_lea.vmem %s733_s0, %s446_s22  ;;  %p519_p13 = pneg %p518_p12 }
  0x19   : > { %v139_v1 = vld [vmem:[%s138_s25] sm:$0xff]  ;;  %s522_s21 = scalar_lea.vmem %s521_s17, 256  ;;  %p523_p0 = scmp.lt.s32.totalorder %s691_s5, %s521_s17 }
  0x1a   : > { %143 = vperm.xlu0 %511, %v139_v1   ;;  %p524_p1 = scmp.lt.s32.totalorder %s522_s21, %s516_s16 }
  0x1c   : > { %p525_p2 = por %p524_p1, %p523_p0 }
  0x1e   : > { %p526_p3 = pnand %p525_p2, %p519_p13 }
  0x99   : > { %v144_v3 = vpop.permute.xlu0 %143 }
  0x9a   : > { %v660_v4 = vmul.f32 %v447_v2, %v144_v3 }
  0x9c   : > { %v156_v5 = vand.u32 2139095040, %v660_v4  ;;  %v153_v9 = vand.u32 2147483647, %v660_v4  ;;  %vm155_vm7 = vcmp.lt.s32.totalorder %v660_v4, 0 }
  0x9e   : > { %v157_v6 = vshrl.u32 %v156_v5, 23  ;;  %v160_v12 = vand.u32 8388607, %v153_v9  ;;  %vm154_vm8 = vcmp.le.f32.partialorder %v153_v9, 0.7853982 }
  0xa0   : > { %v448_v7 = vadd.s32 4294967169, %v157_v6  ;;  %v161_v31 = vor.u32 8388608, %v160_v12 }
  0xa2   : > { %v163_v8 = vadd.s32 1, %v448_v7  ;;  %v201_v45 = vshll.u32 %v161_v31, 8 }
  0xa4   : > { %vm164_vm0 = vcmp.gt.s32.totalorder %v163_v8, 0 }
  0xa5   : > { %v165_v10 = vsel %vm164_vm0, %v163_v8, 0  ;;  %vm245_vm0 = vweird.f32 %v660_v4 }
  0xa6   : > { %v167_v11 = vand.u32 31, %v165_v10  ;;  %v166_v14 = vshrl.u32 %v165_v10, 5 }
  0xa8   : > { %v168_v13 = vsub.s32 32, %v167_v11  ;;  %v170_v16 = vshll.u32 %v581_v15, %v167_v11  ;;  %v173_v18 = vshll.u32 %v582_v17, %v167_v11  ;;  %v176_v22 = vshll.u32 %v583_v20, %v167_v11 }
  0xa9   : > { %v179_v25 = vshll.u32 %v584_v23, %v167_v11  ;;  %v182_v28 = vshll.u32 %v585_v26, %v167_v11  ;;  %vm185_vm1 = vcmp.lt.s32.totalorder %v166_v14, 1  ;;  %vm188_vm2 = vcmp.lt.s32.totalorder %v166_v14, 4 }
  0xaa   : > { %v171_v19 = vshrl.u32 %v582_v17, %v168_v13  ;;  %v174_v21 = vshrl.u32 %v583_v20, %v168_v13  ;;  %v177_v24 = vshrl.u32 %v584_v23, %v168_v13  ;;  %v180_v27 = vshrl.u32 %v585_v26, %v168_v13 }
  0xab   : > { %v183_v30 = vshrl.u32 %v586_v29, %v168_v13  ;;  %v169_v40 = vshrl.u32 %v581_v15, %v168_v13  ;;  %vm187_vm3 = vcmp.lt.s32.totalorder %v166_v14, 3  ;;  %vm186_vm4 = vcmp.lt.s32.totalorder %v166_v14, 2 }
  0xac   : > { %v172_v32 = vor.u32 %v171_v19, %v170_v16  ;;  %v175_v33 = vor.u32 %v174_v21, %v173_v18  ;;  %v178_v34 = vor.u32 %v177_v24, %v176_v22  ;;  %v181_v35 = vor.u32 %v180_v27, %v179_v25 }
  0xad   : > { %v184_v36 = vor.u32 %v183_v30, %v182_v28 }
  0xae   : > { %v190_v37 = vsel %vm188_vm2, %v178_v34, 2102212464  ;;  %v193_v38 = vsel %vm185_vm1, %v172_v32, %v175_v33  ;;  %v197_v39 = vsel %vm185_vm1, %v175_v33, %v178_v34  ;;  %v194_v41 = vsel %vm188_vm2, %v181_v35, 920167782 }
  0xaf   : > { %v198_v42 = vsel %vm188_vm2, %v184_v36, 1326507024  ;;  %v195_v43 = vsel %vm187_vm3, %v178_v34, %v194_v41  ;;  %v189_v46 = vsel %vm185_vm1, %v169_v40, %v172_v32  ;;  %v191_v47 = vsel %vm187_vm3, %v175_v33, %v190_v37 }
  0xb0   : > { %v199_v44 = vsel %vm187_vm3, %v181_v35, %v198_v42  ;;  %v196_v48 = vsel %vm186_vm4, %v193_v38, %v195_v43  ;;  %v192_v54 = vsel %vm186_vm4, %v189_v46, %v191_v47  ;;  %vm366_vm1 = vcmask 261248  }
  0xb1   : > { %v200_v49 = vsel %vm186_vm4, %v197_v39, %v199_v44  ;;  %v669_v52 = vmul.u32.u64.low %v201_v45, %v196_v48  ;;  %v670_v53 = vmul.u32.u64.high %v201_v45, %v196_v48, %v669_v52  ;;  %v208_v56 = vmul.u32 %v201_v45, %v192_v54 }
  0xb2   : > { %v666_v50 = vmul.u32.u64.low %v201_v45, %v200_v49  ;;  %v667_v51 = vmul.u32.u64.high %v201_v45, %v200_v49, %v666_v50 }
  0xb3   : > { %v211_v55 = vadd.s32 1, %v670_v53 }
  0xb4   : > { %vm210_vm5 = vc.u32 %v667_v51, %v669_v52  ;;  %v209_v5 = vadd.s32 %v669_v52, %v667_v51 }
  0xb5   : > { %v212_v57 = vsel %vm210_vm5, %v211_v55, %v670_v53 }
  0xb6   : > { %v213_v58 = vadd.s32 %v212_v57, %v208_v56 }
  0xb8   : > { %v214_v59 = vadd.s32 536870912, %v213_v58 }
  0xba   : > { %v215_v60 = vshrl.u32 %v214_v59, 30 }
  0xbc   : > { %v216_v61 = vshll.u32 %v215_v60, 30  ;;  %v239_v18 = vsub.s32 4, %v215_v60 }
  0xbe   : > { %v217_v62 = vsub.s32 %v213_v58, %v216_v61  ;;  %v240_v21 = vsel %vm155_vm7, %v239_v18, %v215_v60 }
  0xbf   : > { %v242_v23 = vsel %vm154_vm8, 0, %v240_v21 }
  0xc0   : > { %v219_v63 = vsub.s32 0, %v217_v62  ;;  %v246_v24 = vadd.s32 3, %v242_v23  ;;  %v352_v26 = vand.u32 3, %v242_v23 }
  0xc2   : > { %v449_v0 = vmin.u32 %v219_v63, %v217_v62  ;;  %v247_v25 = vand.u32 3, %v246_v24  ;;  %vm357_vm10 = vcmp.eq.s32.totalorder %v352_v26, 2  ;;  %vm354_vm13 = vcmp.eq.s32.totalorder %v352_v26, 0 }
  0xc3   : > { %vm353_vm15 = vcmp.lt.s32.totalorder %v352_v26, 2 }
  0xc4   : > { %v221_v1 = vclz %v449_v0  ;;  %vm252_vm9 = vcmp.eq.s32.totalorder %v247_v25, 2  ;;  %vm249_vm12 = vcmp.eq.s32.totalorder %v247_v25, 0  ;;  %vm248_vm14 = vcmp.lt.s32.totalorder %v247_v25, 2 }
  0xc6   : > { %v450_v2 = vadd.s32 4294967294, %v221_v1 }
  0xc8   : > { %vm451_vm6 = vcmp.lt.s32.totalorder %v450_v2, 0 }
  0xc9   : > { %v224_v3 = vsel %vm451_vm6, 0, %v450_v2 }
  0xca   : > { %v225_v6 = vsub.s32 32, %v224_v3  ;;  %v229_v7 = vsub.s32 4294967266, %v224_v3  ;;  %v226_v8 = vshll.u32 %v217_v62, %v224_v3 }
  0xcc   : > { %v227_v10 = vshrl.u32 %v209_v5, %v225_v6  ;;  %v230_v11 = vadd.s32 127, %v229_v7 }
  0xce   : > { %v228_v12 = vor.u32 %v227_v10, %v226_v8  ;;  %v231_v13 = vshll.u32 %v230_v11, 23 }
  0xd0   : > { %v232_v14 = vor.u32 4788187, %v231_v13  ;;  %v235_v16 = vcvt.s32.f32 %v228_v12 }
  0xd2   : > { %v233_v15 = vand.u32 2147483647, %v232_v14 }
  0xd4   : > { %v236_v17 = vmul.f32 %v235_v16, %v233_v15 }
  0xd6   : > { %v237_v19 = vxor.u32 2147483648, %v236_v17 }
  0xd8   : > { %v238_v20 = vsel %vm155_vm7, %v237_v19, %v236_v17 }
  0xd9   : > { %v241_v22 = vsel %vm154_vm8, %v660_v4, %v238_v20 }
  0xda   : > { %512 = vcosq.f32 %v241_v22 }
  0xdb   : > { %514 = vsinq.f32 %v241_v22 }
  0xe4   : > { %v513_v27 = vpop.eup %512 }
  0xe5   : > { %v515_v28 = vpop.eup %514  ;;  %v253_v29 = vxor.u32 2147483648, %v513_v27 }
  0xe6   : > { %v250_v30 = vxor.u32 2147483648, %v515_v28 }
  0xe7   : > { %v359_v9 = vsel %vm357_vm10, %v253_v29, %v515_v28  ;;  %v254_v31 = vsel %vm252_vm9, %v253_v29, %v515_v28 }
  0xe8   : > { %v356_v32 = vsel %vm354_vm13, %v513_v27, %v250_v30  ;;  %v251_v33 = vsel %vm249_vm12, %v513_v27, %v250_v30 }
  0xe9   : > { %v360_v34 = vsel %vm353_vm15, %v356_v32, %v359_v9  ;;  %v255_v35 = vsel %vm248_vm14, %v251_v33, %v254_v31 }
  0xea   : > { %v361_v36 = vsel %vm245_vm0, nan, %v360_v34  ;;  %v256_v37 = vsel %vm245_vm0, nan, %v255_v35 }
  0xeb   : > { %363 = vrot.lane.b32.xlu0 %v361_v36, %s587_s30  ;;  %258 = vst.msk [vmem:[%s134_s3] sm:$0xff] %vm257_vm11, %v256_v37 }
 0x15d   : > { %v364_v4 = vpop.permute.xlu0 %363 }
 0x15e   : > { %367 = vst.msk [vmem:[%s134_s3] sm:$0xff] %vm366_vm1, %v364_v4 }
 0x15f   : > { %529 = shalt.err (!%p526_p3)
}
 0x160   : > { %s530_s22 = scalar_lea.hbm %s689_s8, 128  ;;  %s534_s25 = scalar_lea.hbm %s735_s2, 384 }
 0x161   : > { %p531_p4 = scmp.ne.s32.totalorder %s689_s8, %s530_s22  ;;  %p535_p9 = scmp.lt.u32.totalorder %s689_s8, %s735_s2 }
 0x162   : > { %p536_p10 = scmp.lt.u32.totalorder %s534_s25, %s530_s22  ;;  %p538_p12 = scmp.lt.u32.totalorder %s530_s22, %s689_s8 }
 0x163   : > { %p532_p7 = pnand %p531_p4, %p642_p5 }
 0x164   : > { %p537_p11 = por %p536_p10, %p535_p9 }
 0x165   : > { %p533_p8 = pneg %p532_p7 }
 0x166   : > { %p539_p13 = por %p538_p12, %p537_p11 }
 0x168   : > { %p540_p0 = pnand %p539_p13, %p533_p8 }
 0x16a   : > { %543 = shalt.err (!%p540_p0)
}
 0x16b   : > { %464 = dma.vmem_to_hbm [thread:$0]  (%p642_p5), %s691_s5, 128, %s689_s8, %s369_s14  }
 0x16c PF: > { %p470_p1 = scmp.ge.s32.totalorder %s578_s12, 2  ;;  %s394_s28 = sand.u32 1, %s566_s9  }
 0x16d   : > { %s395_s29 = scalar_lea.sflag [#allocation3], %s394_s28 }
 0x16e   : > { %p467_p2 = pnand %p470_p1, %p646_p6 }
 0x170   : > { %561 = dma.done.wait (!%p467_p2), %s395_s29, 128  }
 0x171   : > { %563 = vsyncadd (!%p467_p2), %s395_s29, 4294967168  ;;  %p12_p3 = scmp.ge.s32.totalorder %s629_s15, 5   ;;  %s738_s9 = smov %s570_s10 }
 0x172   : > { %s739_s10 = smov %s574_s11  ;;  %s740_s11 = smov %s640_s18 }
 0x173   : > { %s741_s12 = smov %s629_s15  ;;  %14 = sbr.rel (!%p12_p3) target bundleno = 3 (0x3), region = 63 }
 0x17a   :  { %400 = vsyncpa [#allocation3], 1 }
 0x17b   :  { %402 = vsyncpa [#allocation3 + $0x1], 1 }

</bundles_post_ra>
